<compile_context>
chip_gen: v6e
topology: v6e:2x2x1
jax: 0.10.0
libtpu: 0.0.40
codegen_flags: <defaults>
</compile_context>

<pallas_src>
import functools

import jax
import jax.numpy as jnp
from jax.experimental import pallas as pl
from jax.experimental.pallas import tpu as pltpu

_LANE = 128
_SUBLANE = 8


def _round_up(x, m):
    return ((x + m - 1) // m) * m


def _lane_groups(hidden):
    """How many independent problems fit side-by-side in the 128 lanes."""
    return max(1, _LANE // hidden) if hidden < _LANE else 1


_VMEM_CAP = None


def _vmem_capacity_bytes():
    """Per-core VMEM capacity (64 MiB on v7x, 128 MiB on v5e/v6e)."""
    global _VMEM_CAP
    if _VMEM_CAP is None:
        cap = 64 * 1024 * 1024  # conservative fallback works on every generation
        try:
            info = pltpu.get_tpu_info()
            cap = int(getattr(info, "vmem_capacity_bytes", cap)) or cap
        except Exception:
            pass
        _VMEM_CAP = cap
    return _VMEM_CAP


def _s2tsa_kernel(x_ref, w1t_ref, b1_ref, wt_ref, b_ref, o_ref, *, seq_valid):
    # x_ref:  (TB, S, H)     packed batch rows (S, H padded to 8 / 128)
    # w1t_ref/wt_ref: (H, H) pre-transposed (block-diagonal) weights, compute dtype
    # b1_ref/b_ref:   (1, H) f32 biases
    # o_ref:  (TB, H)
    tb, s, h = x_ref.shape
    cdt = w1t_ref.dtype                                  # MXU compute dtype
    x = x_ref[...]
    xf = x.reshape(tb * s, h).astype(cdt)                # MXU M-dim = TB*S

    # f = ReLU(x @ W1^T + b1)     (f32 accumulation)
    f = jnp.dot(xf, w1t_ref[...], preferred_element_type=jnp.float32) + b1_ref[...]
    f = jnp.maximum(f, 0.0)

    # logits = f @ W^T + b
    logits = jnp.dot(f.astype(cdt), wt_ref[...],
                     preferred_element_type=jnp.float32) + b_ref[...]
    logits = logits.reshape(tb, s, h)

    # Mask padded seq rows BEFORE the max so they can never set the softmax
    # max (avoids denom underflow -> inf/NaN on pathological inputs).
    if seq_valid < s:
        row = jax.lax.broadcasted_iota(jnp.int32, (1, s, 1), 1)
        logits = logits + jnp.where(row < seq_valid, 0.0, -1e30)

    # Softmax over seq (axis=1) fused with the weighted sum over seq.
    m = jnp.max(logits, axis=1, keepdims=True)           # (TB, 1, H)
    e = jnp.exp(logits - m)                              # (TB, S, H)
    denom = jnp.sum(e, axis=1)                           # (TB, H)
    s_un = jnp.sum(e * x.astype(jnp.float32), axis=1)    # (TB, H)
    o_ref[...] = (s_un / denom).astype(o_ref.dtype)


def s2tsa_prepare(w1, b1, w, b, *, compute_dtype=jnp.float32):
    """Pad/transpose PyTorch-style (out, in) Linear weights ONCE; reuse across calls.

    Weights are laid out block-diagonally when hidden < 128 so `lane_groups`
    independent batch problems share the 128-lane MXU width.
    """
    hidden = w1.shape[0]
    g = _lane_groups(hidden)
    hidden_p = _round_up(g * hidden, _LANE)

    def block_diag_t(wm):
        wt = jnp.transpose(wm).astype(compute_dtype)     # (in, out)
        out = jnp.zeros((hidden_p, hidden_p), compute_dtype)
        for i in range(g):
            out = out.at[i * hidden:(i + 1) * hidden,
                         i * hidden:(i + 1) * hidden].set(wt)
        return out

    def tile_bias(bv):
        bt = jnp.tile(bv.astype(jnp.float32), g)
        return jnp.zeros((1, hidden_p), jnp.float32).at[0, :g * hidden].set(bt)

    return block_diag_t(w1), tile_bias(b1), block_diag_t(w), tile_bias(b)


@functools.partial(jax.jit, static_argnames=("block_batch", "single_buffer_weights"))
def _s2tsa_apply(x, w1t, b1p, wt, bp, *, block_batch=None, single_buffer_weights=True):
    orig_shape = x.shape
    if x.ndim == 4:
        x = x.reshape(orig_shape[0] * orig_shape[1], orig_shape[2], orig_shape[3])
    n, seq, hidden = x.shape
    dtype = x.dtype
    g = _lane_groups(hidden)
    hidden_p = w1t.shape[0]
    if hidden_p != _round_up(g * hidden, _LANE):
        raise ValueError("prepared weights do not match x's hidden size")
    seq_p = _round_up(seq, _SUBLANE)
    itemsize = jnp.dtype(dtype).itemsize
    w_itemsize = jnp.dtype(w1t.dtype).itemsize
    n_packed = -(-n // g)                                # packed batch rows

    # Generation-aware VMEM budget (v7x 64 MiB -> ~52/40 MiB; v5e/v6e 128 MiB
    # -> ~104/80 MiB).
    vmem_cap = _vmem_capacity_bytes()
    vmem_limit = min((vmem_cap * 13) // 16, 112 * 1024 * 1024)
    step_cap = min((vmem_cap * 5) // 8, 96 * 1024 * 1024)

    if block_batch is None:
        # Target an MXU M-dim (tb * seq_p) of ~512 rows; the VMEM cap bounds it.
        tb = max(_SUBLANE, _round_up(-(-512 // seq_p), _SUBLANE))
        tb = min(tb, _round_up(n_packed, _SUBLANE))

        def step_bytes(t):
            x_tile = 2 * t * seq_p * hidden_p * itemsize            # dbl-buffered x
            inter = 4 * t * seq_p * hidden_p * 4                    # f32 f/logits/e
            n_wbuf = 1 if single_buffer_weights else 2
            wts = n_wbuf * 2 * hidden_p * hidden_p * w_itemsize     # resident weights
            outb = 2 * t * hidden_p * itemsize
            return x_tile + inter + wts + outb

        while tb > _SUBLANE and step_bytes(tb) > step_cap:
            tb -= _SUBLANE
        # Keep >= 2 grid steps whenever the batch allows (v7x has 2 TensorCores;
        # on 1-TC parts the extra step costs ~0.35 us, negligible).
        while tb > _SUBLANE and -(-n_packed // tb) < 2:
            tb -= _SUBLANE
    else:
        tb = block_batch
    batch_p = _round_up(n_packed, tb)

    # Pack `g` batch problems along the lane axis and pad to hardware-friendly
    # shapes (zero padding is exact: padded lanes / rows are masked or sliced).
    xg = jnp.pad(x, ((0, n_packed * g - n), (0, 0), (0, 0)))
    xg = xg.reshape(n_packed, g, seq, hidden).transpose(0, 2, 1, 3)
    xg = xg.reshape(n_packed, seq, g * hidden)
    xp = jnp.pad(xg, ((0, batch_p - n_packed), (0, seq_p - seq),
                      (0, hidden_p - g * hidden)))

    # Constant operands never change block index -> single buffer is enough.
    const_kw = {"pipeline_mode": pl.Buffered(1)} if single_buffer_weights else {}
    grid = (batch_p // tb,)
    flops = 4 * batch_p * seq_p * hidden_p * hidden_p + 6 * batch_p * seq_p * hidden_p
    bytes_accessed = (batch_p * seq_p * hidden_p * itemsize
                      + 2 * hidden_p * hidden_p * w_itemsize
                      + 2 * hidden_p * 4
                      + batch_p * hidden_p * itemsize)

    out = pl.pallas_call(
        functools.partial(_s2tsa_kernel, seq_valid=seq),
        out_shape=jax.ShapeDtypeStruct((batch_p, hidden_p), dtype),
        grid_spec=pltpu.PrefetchScalarGridSpec(
            num_scalar_prefetch=0,
            grid=grid,
            in_specs=[
                pl.BlockSpec((tb, seq_p, hidden_p), lambda bi: (bi, 0, 0)),
                pl.BlockSpec((hidden_p, hidden_p), lambda bi: (0, 0), **const_kw),
                pl.BlockSpec((1, hidden_p), lambda bi: (0, 0), **const_kw),
                pl.BlockSpec((hidden_p, hidden_p), lambda bi: (0, 0), **const_kw),
                pl.BlockSpec((1, hidden_p), lambda bi: (0, 0), **const_kw),
            ],
            out_specs=pl.BlockSpec((tb, hidden_p), lambda bi: (bi, 0)),
        ),
        compiler_params=pltpu.CompilerParams(
            dimension_semantics=("parallel",),
            vmem_limit_bytes=vmem_limit,
        ),
        cost_estimate=pl.CostEstimate(
            flops=flops,
            transcendentals=batch_p * seq_p * hidden_p,
            bytes_accessed=bytes_accessed,
        ),
    )(xp, w1t, b1p, wt, bp)

    # Unpack lane groups and strip padding.
    out = out[:n_packed, :g * hidden].reshape(n_packed * g, hidden)[:n]
    if len(orig_shape) == 4:
        out = out.reshape(orig_shape[0], orig_shape[1], hidden)
    return out


_SINGLE_BUFFER_WEIGHTS = True  # flipped off once if pl.Buffered(1) is unsupported


def s2tsa_forward(x, w1, b1, w, b, *, params=None, compute_dtype=None, block_batch=None):
    """x: (batch, seq, hidden) or (batch, block_num, seq, hidden).
    w1, w: PyTorch-style (out, in) Linear weights; b1, b: (hidden,).
    Pass `params=s2tsa_prepare(...)` to reuse padded weights across calls."""
    global _SINGLE_BUFFER_WEIGHTS
    if params is None:
        params = s2tsa_prepare(w1, b1, w, b,
                               compute_dtype=compute_dtype or x.dtype)
    try:
        return _s2tsa_apply(x, *params, block_batch=block_batch,
                            single_buffer_weights=_SINGLE_BUFFER_WEIGHTS)
    except Exception:
        if not _SINGLE_BUFFER_WEIGHTS:
            raise
        # This JAX build rejected pipeline_mode=pl.Buffered(1); fall back to
        # default double-buffered constants (identical semantics).
        _SINGLE_BUFFER_WEIGHTS = False
        return _s2tsa_apply(x, *params, block_batch=block_batch,
                            single_buffer_weights=False)


def s2tsa_reference(x, w1, b1, w, b):
    f = jax.nn.relu(jnp.einsum("...sh,oh->...so", x, w1) + b1)
    logits = jnp.einsum("...sh,oh->...so", f, w) + b
    p = jax.nn.softmax(logits, axis=-2)
    return jnp.sum(p * x, axis=-2)


if __name__ == "__main__":
    batch, seq, hidden = 2, 8, 32
    key = jax.random.PRNGKey(0)
    kx, kw1, kb1, kw, kb, kx4, kx5 = jax.random.split(key, 7)

    x = jax.random.normal(kx, (batch, seq, hidden), dtype=jnp.float32)
    # PyTorch Linear init style: weight (out, in), bias (out,)
    bound = 1.0 / (hidden ** 0.5)
    w1 = jax.random.uniform(kw1, (hidden, hidden), jnp.float32, -bound, bound)
    b1 = jax.random.uniform(kb1, (hidden,), jnp.float32, -bound, bound)
    w = jax.random.uniform(kw, (hidden, hidden), jnp.float32, -bound, bound)
    b = jax.random.uniform(kb, (hidden,), jnp.float32, -bound, bound)

    # Prepare padded / block-diagonal weights once; reuse across calls.
    params = s2tsa_prepare(w1, b1, w, b, compute_dtype=jnp.float32)

    out = jax.block_until_ready(s2tsa_forward(x, w1, b1, w, b, params=params))
    ref = s2tsa_reference(x, w1, b1, w, b)
    assert out.shape == (batch, hidden)
    assert jnp.allclose(out, ref, atol=1e-3, rtol=1e-3), "mismatch vs reference (3D)"

    # Optional (block_num) axis: (batch, block_num, seq, hidden)
    x4 = jax.random.normal(kx4, (batch, 3, seq, hidden), dtype=jnp.float32)
    out4 = jax.block_until_ready(s2tsa_forward(x4, w1, b1, w, b, params=params))
    ref4 = s2tsa_reference(x4, w1, b1, w, b)
    assert out4.shape == (batch, 3, hidden)
    assert jnp.allclose(out4, ref4, atol=1e-3, rtol=1e-3), "mismatch vs reference (4D)"

    # Non-multiple-of-8 seq_len exercises the mask-before-max padding path.
    x5 = jax.random.normal(kx5, (batch, 6, hidden), dtype=jnp.float32)
    out5 = jax.block_until_ready(s2tsa_forward(x5, w1, b1, w, b, params=params))
    ref5 = s2tsa_reference(x5, w1, b1, w, b)
    assert out5.shape == (batch, hidden)
    assert jnp.allclose(out5, ref5, atol=1e-3, rtol=1e-3), "mismatch vs reference (seq pad)"

    # bf16 MXU path (weights + matmul inputs in bf16, f32 accumulation).
    out_bf = jax.block_until_ready(
        s2tsa_forward(x, w1, b1, w, b, compute_dtype=jnp.bfloat16))
    assert out_bf.shape == (batch, hidden)
    assert jnp.allclose(out_bf, ref, atol=1e-1, rtol=1e-1), "mismatch vs reference (bf16)"

    print("KERNEL_OK")
</pallas_src>

<mosaic_0001>
module attributes {stable_mosaic.version = 11 : i64} {
  func.func @_s2tsa_kernel(%arg0: i32, %arg1: memref<8x8x128xf32, #tpu.memory_space<vmem>>, %arg2: memref<128x128xf32, #tpu.memory_space<vmem>>, %arg3: memref<1x128xf32, #tpu.memory_space<vmem>>, %arg4: memref<128x128xf32, #tpu.memory_space<vmem>>, %arg5: memref<1x128xf32, #tpu.memory_space<vmem>>, %arg6: memref<8x128xf32, #tpu.memory_space<vmem>>) attributes {dimension_semantics = [#tpu.dimension_semantics<parallel>], iteration_bounds = array<i64: 1>, scalar_prefetch = 0 : i64, scratch_operands = 0 : i64, tpu.core_type = #tpu.core_type<tc>, window_params = [{transform_indices = @transform_0, window_bounds = array<i64: 8, 8, 128>}, {pipeline_mode = #tpu.pipeline_mode<synchronous>, transform_indices = @transform_1, window_bounds = array<i64: 128, 128>}, {pipeline_mode = #tpu.pipeline_mode<synchronous>, transform_indices = @transform_2, window_bounds = array<i64: 1, 128>}, {pipeline_mode = #tpu.pipeline_mode<synchronous>, transform_indices = @transform_3, window_bounds = array<i64: 128, 128>}, {pipeline_mode = #tpu.pipeline_mode<synchronous>, transform_indices = @transform_4, window_bounds = array<i64: 1, 128>}, {transform_indices = @transform_5, window_bounds = array<i64: 8, 128>}]} {
    %c0 = arith.constant 0 : index
    %c0_0 = arith.constant 0 : index
    %c0_1 = arith.constant 0 : index
    %0 = vector.load %arg1[%c0, %c0_0, %c0_1] : memref<8x8x128xf32, #tpu.memory_space<vmem>>, vector<8x8x128xf32>
    %1 = vector.shape_cast %0 : vector<8x8x128xf32> to vector<64x128xf32>
    %c0_2 = arith.constant 0 : index
    %c0_3 = arith.constant 0 : index
    %2 = vector.load %arg2[%c0_2, %c0_3] : memref<128x128xf32, #tpu.memory_space<vmem>>, vector<128x128xf32>
    %cst = arith.constant dense<0.000000e+00> : vector<64x128xf32>
    %3 = tpu.matmul %1, %2, %cst {dimension_numbers = #tpu.dot_dimension_numbers<[1], [0], [0], [1], [0, 0, 1, 1], [], []>} : vector<64x128xf32>, vector<128x128xf32>, vector<64x128xf32> -> vector<64x128xf32>
    %c0_4 = arith.constant 0 : index
    %c0_5 = arith.constant 0 : index
    %4 = vector.load %arg3[%c0_4, %c0_5] : memref<1x128xf32, #tpu.memory_space<vmem>>, vector<1x128xf32>
    %5 = vector.broadcast %4 : vector<1x128xf32> to vector<64x128xf32>
    %6 = arith.addf %3, %5 : vector<64x128xf32>
    %cst_6 = arith.constant 0.000000e+00 : f32
    %7 = vector.broadcast %cst_6 : f32 to vector<64x128xf32>
    %8 = arith.maximumf %6, %7 : vector<64x128xf32>
    %c0_7 = arith.constant 0 : index
    %c0_8 = arith.constant 0 : index
    %9 = vector.load %arg4[%c0_7, %c0_8] : memref<128x128xf32, #tpu.memory_space<vmem>>, vector<128x128xf32>
    %cst_9 = arith.constant dense<0.000000e+00> : vector<64x128xf32>
    %10 = tpu.matmul %8, %9, %cst_9 {dimension_numbers = #tpu.dot_dimension_numbers<[1], [0], [0], [1], [0, 0, 1, 1], [], []>} : vector<64x128xf32>, vector<128x128xf32>, vector<64x128xf32> -> vector<64x128xf32>
    %c0_10 = arith.constant 0 : index
    %c0_11 = arith.constant 0 : index
    %11 = vector.load %arg5[%c0_10, %c0_11] : memref<1x128xf32, #tpu.memory_space<vmem>>, vector<1x128xf32>
    %12 = vector.broadcast %11 : vector<1x128xf32> to vector<64x128xf32>
    %13 = arith.addf %10, %12 : vector<64x128xf32>
    %14 = vector.shape_cast %13 : vector<64x128xf32> to vector<8x8x128xf32>
    %cst_12 = arith.constant dense<0xFF800000> : vector<8x128xf32>
    %15 = vector.multi_reduction <maximumf>, %14, %cst_12 [1] : vector<8x8x128xf32> to vector<8x128xf32>
    %16 = vector.shape_cast %15 : vector<8x128xf32> to vector<8x1x128xf32>
    %17 = vector.broadcast %16 : vector<8x1x128xf32> to vector<8x8x128xf32>
    %18 = arith.subf %14, %17 : vector<8x8x128xf32>
    %19 = math.exp %18 : vector<8x8x128xf32>
    %cst_13 = arith.constant dense<0.000000e+00> : vector<8x128xf32>
    %20 = vector.multi_reduction <add>, %19, %cst_13 [1] : vector<8x8x128xf32> to vector<8x128xf32>
    %21 = arith.mulf %19, %0 : vector<8x8x128xf32>
    %cst_14 = arith.constant dense<0.000000e+00> : vector<8x128xf32>
    %22 = vector.multi_reduction <add>, %21, %cst_14 [1] : vector<8x8x128xf32> to vector<8x128xf32>
    %23 = arith.divf %22, %20 : vector<8x128xf32>
    %c0_15 = arith.constant 0 : index
    %c0_16 = arith.constant 0 : index
    %24 = vector.load %arg6[%c0_15, %c0_16] : memref<8x128xf32, #tpu.memory_space<vmem>>, vector<8x128xf32>
    tpu.vector_store %arg6[%c0_15, %c0_16], %23 {strides = array<i32>} : memref<8x128xf32, #tpu.memory_space<vmem>>, vector<8x128xf32>,
    return
  }
  func.func @transform_0(%arg0: i32) -> (i32, i32, i32) {
    %c0_i32 = arith.constant 0 : i32
    %c0_i32_0 = arith.constant 0 : i32
    %c0_i32_1 = arith.constant 0 : i32
    return %arg0, %c0_i32, %c0_i32_0 : i32, i32, i32
  }
  func.func @transform_1(%arg0: i32) -> (i32, i32) {
    %c0_i32 = arith.constant 0 : i32
    %c0_i32_0 = arith.constant 0 : i32
    %c0_i32_1 = arith.constant 0 : i32
    return %c0_i32, %c0_i32_0 : i32, i32
  }
  func.func @transform_2(%arg0: i32) -> (i32, i32) {
    %c0_i32 = arith.constant 0 : i32
    %c0_i32_0 = arith.constant 0 : i32
    %c0_i32_1 = arith.constant 0 : i32
    return %c0_i32, %c0_i32_0 : i32, i32
  }
  func.func @transform_3(%arg0: i32) -> (i32, i32) {
    %c0_i32 = arith.constant 0 : i32
    %c0_i32_0 = arith.constant 0 : i32
    %c0_i32_1 = arith.constant 0 : i32
    return %c0_i32, %c0_i32_0 : i32, i32
  }
  func.func @transform_4(%arg0: i32) -> (i32, i32) {
    %c0_i32 = arith.constant 0 : i32
    %c0_i32_0 = arith.constant 0 : i32
    %c0_i32_1 = arith.constant 0 : i32
    return %c0_i32, %c0_i32_0 : i32, i32
  }
  func.func @transform_5(%arg0: i32) -> (i32, i32) {
    %c0_i32 = arith.constant 0 : i32
    %c0_i32_0 = arith.constant 0 : i32
    return %arg0, %c0_i32 : i32, i32
  }
}

module attributes {stable_mosaic.version = 11 : i64} {
  func.func @_s2tsa_kernel(%arg0: i32, %arg1: memref<8x8x128xf32, #tpu.memory_space<vmem>>, %arg2: memref<128x128xf32, #tpu.memory_space<vmem>>, %arg3: memref<1x128xf32, #tpu.memory_space<vmem>>, %arg4: memref<128x128xf32, #tpu.memory_space<vmem>>, %arg5: memref<1x128xf32, #tpu.memory_space<vmem>>, %arg6: memref<8x128xf32, #tpu.memory_space<vmem>>) attributes {dimension_semantics = [#tpu.dimension_semantics<parallel>], iteration_bounds = array<i64: 1>, scalar_prefetch = 0 : i64, scratch_operands = 0 : i64, tpu.core_type = #tpu.core_type<tc>, window_params = [{transform_indices = @transform_0, window_bounds = array<i64: 8, 8, 128>}, {pipeline_mode = #tpu.pipeline_mode<synchronous>, transform_indices = @transform_1, window_bounds = array<i64: 128, 128>}, {pipeline_mode = #tpu.pipeline_mode<synchronous>, transform_indices = @transform_2, window_bounds = array<i64: 1, 128>}, {pipeline_mode = #tpu.pipeline_mode<synchronous>, transform_indices = @transform_3, window_bounds = array<i64: 128, 128>}, {pipeline_mode = #tpu.pipeline_mode<synchronous>, transform_indices = @transform_4, window_bounds = array<i64: 1, 128>}, {transform_indices = @transform_5, window_bounds = array<i64: 8, 128>}]} {
    %c0 = arith.constant 0 : index
    %c0_0 = arith.constant 0 : index
    %c0_1 = arith.constant 0 : index
    %0 = vector.load %arg1[%c0, %c0_0, %c0_1] : memref<8x8x128xf32, #tpu.memory_space<vmem>>, vector<8x8x128xf32>
    %1 = vector.shape_cast %0 : vector<8x8x128xf32> to vector<64x128xf32>
    %c0_2 = arith.constant 0 : index
    %c0_3 = arith.constant 0 : index
    %2 = vector.load %arg2[%c0_2, %c0_3] : memref<128x128xf32, #tpu.memory_space<vmem>>, vector<128x128xf32>
    %cst = arith.constant dense<0.000000e+00> : vector<64x128xf32>
    %3 = tpu.matmul %1, %2, %cst {dimension_numbers = #tpu.dot_dimension_numbers<[1], [0], [0], [1], [0, 0, 1, 1], [], []>} : vector<64x128xf32>, vector<128x128xf32>, vector<64x128xf32> -> vector<64x128xf32>
    %c0_4 = arith.constant 0 : index
    %c0_5 = arith.constant 0 : index
    %4 = vector.load %arg3[%c0_4, %c0_5] : memref<1x128xf32, #tpu.memory_space<vmem>>, vector<1x128xf32>
    %5 = vector.broadcast %4 : vector<1x128xf32> to vector<64x128xf32>
    %6 = arith.addf %3, %5 : vector<64x128xf32>
    %cst_6 = arith.constant 0.000000e+00 : f32
    %7 = vector.broadcast %cst_6 : f32 to vector<64x128xf32>
    %8 = arith.maximumf %6, %7 : vector<64x128xf32>
    %c0_7 = arith.constant 0 : index
    %c0_8 = arith.constant 0 : index
    %9 = vector.load %arg4[%c0_7, %c0_8] : memref<128x128xf32, #tpu.memory_space<vmem>>, vector<128x128xf32>
    %cst_9 = arith.constant dense<0.000000e+00> : vector<64x128xf32>
    %10 = tpu.matmul %8, %9, %cst_9 {dimension_numbers = #tpu.dot_dimension_numbers<[1], [0], [0], [1], [0, 0, 1, 1], [], []>} : vector<64x128xf32>, vector<128x128xf32>, vector<64x128xf32> -> vector<64x128xf32>
    %c0_10 = arith.constant 0 : index
    %c0_11 = arith.constant 0 : index
    %11 = vector.load %arg5[%c0_10, %c0_11] : memref<1x128xf32, #tpu.memory_space<vmem>>, vector<1x128xf32>
    %12 = vector.broadcast %11 : vector<1x128xf32> to vector<64x128xf32>
    %13 = arith.addf %10, %12 : vector<64x128xf32>
    %14 = vector.shape_cast %13 : vector<64x128xf32> to vector<8x8x128xf32>
    %cst_12 = arith.constant dense<0xFF800000> : vector<8x128xf32>
    %15 = vector.multi_reduction <maximumf>, %14, %cst_12 [1] : vector<8x8x128xf32> to vector<8x128xf32>
    %16 = vector.shape_cast %15 : vector<8x128xf32> to vector<8x1x128xf32>
    %17 = vector.broadcast %16 : vector<8x1x128xf32> to vector<8x8x128xf32>
    %18 = arith.subf %14, %17 : vector<8x8x128xf32>
    %19 = math.exp %18 : vector<8x8x128xf32>
    %cst_13 = arith.constant dense<0.000000e+00> : vector<8x128xf32>
    %20 = vector.multi_reduction <add>, %19, %cst_13 [1] : vector<8x8x128xf32> to vector<8x128xf32>
    %21 = arith.mulf %19, %0 : vector<8x8x128xf32>
    %cst_14 = arith.constant dense<0.000000e+00> : vector<8x128xf32>
    %22 = vector.multi_reduction <add>, %21, %cst_14 [1] : vector<8x8x128xf32> to vector<8x128xf32>
    %23 = arith.divf %22, %20 : vector<8x128xf32>
    %c0_15 = arith.constant 0 : index
    %c0_16 = arith.constant 0 : index
    %24 = vector.load %arg6[%c0_15, %c0_16] : memref<8x128xf32, #tpu.memory_space<vmem>>, vector<8x128xf32>
    tpu.vector_store %arg6[%c0_15, %c0_16], %23 {strides = array<i32>} : memref<8x128xf32, #tpu.memory_space<vmem>>, vector<8x128xf32>,
    return
  }
  func.func @transform_0(%arg0: i32) -> (i32, i32, i32) {
    %c0_i32 = arith.constant 0 : i32
    %c0_i32_0 = arith.constant 0 : i32
    %c0_i32_1 = arith.constant 0 : i32
    return %arg0, %c0_i32, %c0_i32_0 : i32, i32, i32
  }
  func.func @transform_1(%arg0: i32) -> (i32, i32) {
    %c0_i32 = arith.constant 0 : i32
    %c0_i32_0 = arith.constant 0 : i32
    %c0_i32_1 = arith.constant 0 : i32
    return %c0_i32, %c0_i32_0 : i32, i32
  }
  func.func @transform_2(%arg0: i32) -> (i32, i32) {
    %c0_i32 = arith.constant 0 : i32
    %c0_i32_0 = arith.constant 0 : i32
    %c0_i32_1 = arith.constant 0 : i32
    return %c0_i32, %c0_i32_0 : i32, i32
  }
  func.func @transform_3(%arg0: i32) -> (i32, i32) {
    %c0_i32 = arith.constant 0 : i32
    %c0_i32_0 = arith.constant 0 : i32
    %c0_i32_1 = arith.constant 0 : i32
    return %c0_i32, %c0_i32_0 : i32, i32
  }
  func.func @transform_4(%arg0: i32) -> (i32, i32) {
    %c0_i32 = arith.constant 0 : i32
    %c0_i32_0 = arith.constant 0 : i32
    %c0_i32_1 = arith.constant 0 : i32
    return %c0_i32, %c0_i32_0 : i32, i32
  }
  func.func @transform_5(%arg0: i32) -> (i32, i32) {
    %c0_i32 = arith.constant 0 : i32
    %c0_i32_0 = arith.constant 0 : i32
    return %arg0, %c0_i32 : i32, i32
  }
}

</mosaic_0001>

<bundles_post_ra>
// kernel: _s2tsa_apply.1
= control target key start
LH: loop header
LB: loop body
LE: loop exit
PB: predicated region body
PF: predicated region fallthrough
CT: control target
= control target key end

     0   :  { %10 = vsyncpa [#allocation3], 0  ;;  %s722_s18 = smov [#allocation2]   ;;  %s871_s0 = inlined_call_operand.vmem [shape: f32[8,8,128], index: 0, kind: input, shape index: {}]   ;;  %s872_s1 = inlined_call_operand.vmem [shape: f32[128,128], index: 1, kind: input, shape index: {}]   ;;  %s873_s2 = inlined_call_operand.vmem [shape: f32[1,128], index: 2, kind: input, shape index: {}]   ;;  %s874_s3 = inlined_call_operand.hbm [shape: f32[128,128], index: 3, kind: input, shape index: {}]   ;;  %s875_s4 = inlined_call_operand.vmem [shape: f32[1,128], index: 4, kind: input, shape index: {}]   ;;  %s876_s5 = inlined_call_operand.vmem [shape: f32[8,128], index: 5, kind: output, shape index: {}]  }
   0x1   :  { %s22_s19 = sshll.u32 %s722_s18, 4  ;;  %s23_s19 = int_to_ptr.vmem [resolvable:$true] %s22_s19 }
   0x2   :  { %s708_s20 = scalar_lea.vmem %s23_s19, 2048  ;;  %p713_p1 = scmp.lt.s32.totalorder %s23_s19, %s23_s19 }
   0x3   :  { %p709_p0 = scmp.ne.s32.totalorder %s23_s19, %s708_s20  ;;  %p714_p2 = scmp.lt.s32.totalorder %s708_s20, %s708_s20 }
   0x5   :  { %p715_p3 = por %p714_p2, %p713_p1 }
   0x7   :  { %p716_p4 = pnand %p715_p3, %p709_p0 }
   0x9   :  { %719 = shalt.err (!%p716_p4)
}
   0xa   :  { %s723_s21 = smov 128   ;;  %s724_s22 = smov 8  }
   0xb   :  { %28 = dma.hbm_to_vmem [thread:$0]  %s874_s3, 2048, %s23_s19, [#allocation3], %s723_s21, %s723_s21, %s724_s22  }
   0xc   :  { %720 = dma.done.wait [#allocation3], 2048  }
   0xd   :  { %721 = vsyncadd [#allocation3], 4294965248  ;;  %v57_v0 = vld [vmem:[%s872_s1 + $0x78] sm:$0xff]  ;;  %v56_v1 = vld [vmem:[%s872_s1 + $0x70] sm:$0xff]  ;;  %vm506_vm0 = vcmask 1041409   ;;  %vm508_vm1 = vcmask 1042434  }
   0xe   :  { %577 = vmatprep.subr.mxu0 %v57_v0  ;;  %v55_v2 = vld [vmem:[%s872_s1 + $0x68] sm:$0xff]  ;;  %v54_v3 = vld [vmem:[%s872_s1 + $0x60] sm:$0xff]  ;;  %v53_v5 = vld [vmem:[%s872_s1 + $0x58] sm:$0xff]  ;;  %vm510_vm2 = vcmask 1043459   ;;  %vm512_vm3 = vcmask 1044484   ;;  %vm514_vm4 = vcmask 1045509  }
   0xf   :  { %578 = vmatpush3.msra.mxu0 %v57_v0  ;;  %v773_v4 = vld [vmem:[%s871_s0] sm:$0xff]  ;;  %v52_v6 = vld [vmem:[%s872_s1 + $0x50] sm:$0xff]  ;;  %v193_v7 = vld [vmem:[#allocation2 + $0x78] sm:$0xff]  ;;  %vm516_vm5 = vcmask 1046534   ;;  %vm518_vm6 = vcmask 1047559  }
  0x10   :  { %579 = vmatprep.subr.mxu0 %v56_v1  ;;  %609 = vmatprep.mubr.f32.mxu0 %v773_v4  ;;  %v192_v8 = vld [vmem:[#allocation2 + $0x70] sm:$0xff]  ;;  %v51_v9 = vld [vmem:[%s872_s1 + $0x48] sm:$0xff]  ;;  %v50_v11 = vld [vmem:[%s872_s1 + $0x40] sm:$0xff] }
  0x11   :  { %580 = vmatpush3.msra.mxu0 %v56_v1  ;;  %621 = vmatprep.subr.mxu1 %v193_v7  ;;  %v191_v10 = vld [vmem:[#allocation2 + $0x68] sm:$0xff]  ;;  %v190_v12 = vld [vmem:[#allocation2 + $0x60] sm:$0xff]  ;;  %v49_v13 = vld [vmem:[%s872_s1 + $0x38] sm:$0xff] }
  0x12   :  { %581 = vmatprep.subr.mxu0 %v55_v2  ;;  %622 = vmatpush3.msra.mxu1 %v193_v7  ;;  %v189_v14 = vld [vmem:[#allocation2 + $0x58] sm:$0xff]  ;;  %v48_v15 = vld [vmem:[%s872_s1 + $0x30] sm:$0xff]  ;;  %v47_v17 = vld [vmem:[%s872_s1 + $0x28] sm:$0xff] }
  0x13   :  { %582 = vmatpush3.msra.mxu0 %v55_v2  ;;  %623 = vmatprep.subr.mxu1 %v192_v8  ;;  %v188_v16 = vld [vmem:[#allocation2 + $0x50] sm:$0xff]  ;;  %v187_v18 = vld [vmem:[#allocation2 + $0x48] sm:$0xff]  ;;  %v46_v19 = vld [vmem:[%s872_s1 + $0x20] sm:$0xff] }
  0x14   :  { %583 = vmatprep.subr.mxu0 %v54_v3  ;;  %624 = vmatpush3.msra.mxu1 %v192_v8  ;;  %v186_v20 = vld [vmem:[#allocation2 + $0x40] sm:$0xff]  ;;  %v45_v21 = vld [vmem:[%s872_s1 + $0x18] sm:$0xff]  ;;  %v44_v23 = vld [vmem:[%s872_s1 + $0x10] sm:$0xff] }
  0x15   :  { %584 = vmatpush3.msra.mxu0 %v54_v3  ;;  %625 = vmatprep.subr.mxu1 %v191_v10  ;;  %v185_v22 = vld [vmem:[#allocation2 + $0x38] sm:$0xff]  ;;  %v184_v24 = vld [vmem:[#allocation2 + $0x30] sm:$0xff]  ;;  %v43_v25 = vld [vmem:[%s872_s1 + $0x8] sm:$0xff] }
  0x16   :  { %585 = vmatprep.subr.mxu0 %v53_v5  ;;  %626 = vmatpush3.msra.mxu1 %v191_v10  ;;  %v183_v26 = vld [vmem:[#allocation2 + $0x28] sm:$0xff]  ;;  %v42_v27 = vld [vmem:[%s872_s1] sm:$0xff]  ;;  %v820_v30 = vld [vmem:[%s871_s0 + $0x10] sm:$0xff] }
  0x17   :  { %586 = vmatpush3.msra.mxu0 %v53_v5  ;;  %627 = vmatprep.subr.mxu1 %v190_v12  ;;  %v182_v28 = vld [vmem:[#allocation2 + $0x20] sm:$0xff]  ;;  %v815_v29 = vld [vmem:[%s871_s0 + $0x8] sm:$0xff]  ;;  %v827_v31 = vld [vmem:[%s871_s0 + $0x18] sm:$0xff] }
  0x18   :  { %587 = vmatprep.subr.mxu0 %v52_v6  ;;  %628 = vmatpush3.msra.mxu1 %v190_v12  ;;  %v832_v32 = vld [vmem:[%s871_s0 + $0x20] sm:$0xff]  ;;  %v839_v33 = vld [vmem:[%s871_s0 + $0x28] sm:$0xff]  ;;  %v844_v34 = vld [vmem:[%s871_s0 + $0x30] sm:$0xff] }
  0x19   :  { %588 = vmatpush3.msra.mxu0 %v52_v6  ;;  %629 = vmatprep.subr.mxu1 %v189_v14  ;;  %v851_v35 = vld [vmem:[%s871_s0 + $0x38] sm:$0xff]  ;;  %v180_v37 = vld [vmem:[#allocation2 + $0x10] sm:$0xff]  ;;  %v179_v38 = vld [vmem:[#allocation2 + $0x8] sm:$0xff] }
  0x1a   :  { %589 = vmatprep.subr.mxu0 %v51_v9  ;;  %630 = vmatpush3.msra.mxu1 %v189_v14  ;;  %v181_v36 = vld [vmem:[#allocation2 + $0x18] sm:$0xff]  ;;  %v178_v39 = vld [vmem:[#allocation2] sm:$0xff] }
  0x1b   :  { %590 = vmatpush3.msra.mxu0 %v51_v9  ;;  %631 = vmatprep.subr.mxu1 %v188_v16  ;;  %v527_v40 = vld [vmem:[%s873_s2] ss:$0 sm:$0xff] }
  0x1c   :  { %591 = vmatprep.subr.mxu0 %v50_v11  ;;  %632 = vmatpush3.msra.mxu1 %v188_v16  ;;  %v528_v1 = vld [vmem:[%s875_s4] ss:$0 sm:$0xff] }
  0x1d   :  { %592 = vmatpush3.msra.mxu0 %v50_v11  ;;  %633 = vmatprep.subr.mxu1 %v187_v18 }
  0x1e   :  { %593 = vmatprep.subr.mxu0 %v49_v13  ;;  %634 = vmatpush3.msra.mxu1 %v187_v18 }
  0x1f   :  { %594 = vmatpush3.msra.mxu0 %v49_v13  ;;  %635 = vmatprep.subr.mxu1 %v186_v20 }
  0x20   :  { %595 = vmatprep.subr.mxu0 %v48_v15  ;;  %636 = vmatpush3.msra.mxu1 %v186_v20 }
  0x21   :  { %596 = vmatpush3.msra.mxu0 %v48_v15  ;;  %637 = vmatprep.subr.mxu1 %v185_v22 }
  0x22   :  { %597 = vmatprep.subr.mxu0 %v47_v17  ;;  %638 = vmatpush3.msra.mxu1 %v185_v22 }
  0x23   :  { %598 = vmatpush3.msra.mxu0 %v47_v17  ;;  %639 = vmatprep.subr.mxu1 %v184_v24 }
  0x24   :  { %599 = vmatprep.subr.mxu0 %v46_v19  ;;  %640 = vmatpush3.msra.mxu1 %v184_v24 }
  0x25   :  { %600 = vmatpush3.msra.mxu0 %v46_v19  ;;  %641 = vmatprep.subr.mxu1 %v183_v26 }
  0x26   :  { %601 = vmatprep.subr.mxu0 %v45_v21  ;;  %642 = vmatpush3.msra.mxu1 %v183_v26 }
  0x27   :  { %602 = vmatpush3.msra.mxu0 %v45_v21  ;;  %643 = vmatprep.subr.mxu1 %v182_v28 }
  0x28   :  { %603 = vmatprep.subr.mxu0 %v44_v23  ;;  %644 = vmatpush3.msra.mxu1 %v182_v28 }
  0x29   :  { %604 = vmatpush3.msra.mxu0 %v44_v23  ;;  %645 = vmatprep.subr.mxu1 %v181_v36 }
  0x2a   :  { %605 = vmatprep.subr.mxu0 %v43_v25  ;;  %646 = vmatpush3.msra.mxu1 %v181_v36 }
  0x2b   :  { %606 = vmatpush3.msra.mxu0 %v43_v25  ;;  %647 = vmatprep.subr.mxu1 %v180_v37 }
  0x2c   :  { %607 = vmatprep.subr.mxu0 %v42_v27  ;;  %648 = vmatpush3.msra.mxu1 %v180_v37 }
  0x2d   :  { %608 = vmatpush3.msra.mxu0 %v42_v27  ;;  %649 = vmatprep.subr.mxu1 %v179_v38 }
  0x2e   :  { %610 = vmatmul.mubr.f32.vlgmr.msra.gmra.mxu0 %v815_v29  ;;  %650 = vmatpush3.msra.mxu1 %v179_v38 }
  0x2f   :  { %612 = vmatprep.mubr.f32.mxu0 %v820_v30  ;;  %651 = vmatprep.subr.mxu1 %v178_v39 }
  0x30   :  { %652 = vmatpush3.msra.mxu1 %v178_v39 }
  0x32   :  { %613 = vmatmul.mubr.f32.gmra.mxu0 %v827_v31 }
  0x33   :  { %615 = vmatprep.mubr.f32.mxu0 %v832_v32 }
  0x36   :  { %616 = vmatmul.mubr.f32.gmra.mxu0 %v839_v33 }
  0x37   :  { %618 = vmatprep.mubr.f32.mxu0 %v844_v34 }
  0x3a   :  { %619 = vmatmul.mubr.f32.gmra.mxu0 %v851_v35 }
  0xee   :  { %v611_v41 = vpop.f32.mrf.mxu0 }
  0xef   :  { %v137_v42 = vadd.f32 %v611_v41, %v527_v40 }
  0xf0   :  { %v131_v43 = vpop.f32.mrf.mxu0 }
  0xf1   :  { %v132_v44 = vadd.f32 %v527_v40, %v131_v43  ;;  %v171_v47 = vmax.f32 %v137_v42, 0.0 }
  0xf2   :  { %v614_v45 = vpop.f32.mrf.mxu0 }
  0xf3   :  { %v170_v46 = vmax.f32 %v132_v44, 0.0  ;;  %v147_v48 = vadd.f32 %v614_v45, %v527_v40 }
  0xf4   :  { %v141_v49 = vpop.f32.mrf.mxu0 }
  0xf5   :  { %v142_v50 = vadd.f32 %v527_v40, %v141_v49  ;;  %653 = vmatprep.mubr.f32.mxu1 %v170_v46  ;;  %v173_v53 = vmax.f32 %v147_v48, 0.0 }
  0xf6   :  { %v617_v51 = vpop.f32.mrf.mxu0  ;;  %654 = vmatmul.mubr.f32.vlgmr.msra.gmra.mxu1 %v171_v47 }
  0xf7   :  { %v172_v52 = vmax.f32 %v142_v50, 0.0  ;;  %v157_v54 = vadd.f32 %v617_v51, %v527_v40 }
  0xf8   :  { %v151_v55 = vpop.f32.mrf.mxu0 }
  0xf9   :  { %v152_v56 = vadd.f32 %v527_v40, %v151_v55  ;;  %656 = vmatprep.mubr.f32.mxu1 %v172_v52  ;;  %v175_v59 = vmax.f32 %v157_v54, 0.0 }
  0xfa   :  { %v620_v57 = vpop.f32.mrf.mxu0  ;;  %657 = vmatmul.mubr.f32.gmra.mxu1 %v173_v53 }
  0xfb   :  { %v174_v58 = vmax.f32 %v152_v56, 0.0  ;;  %v167_v60 = vadd.f32 %v620_v57, %v527_v40 }
  0xfc   :  { %v161_v61 = vpop.f32.mrf.mxu0 }
  0xfd   :  { %v162_v62 = vadd.f32 %v527_v40, %v161_v61  ;;  %659 = vmatprep.mubr.f32.mxu1 %v174_v58  ;;  %v177_v0 = vmax.f32 %v167_v60, 0.0 }
  0xfe   :  { %660 = vmatmul.mubr.f32.gmra.mxu1 %v175_v59 }
  0xff   :  { %v176_v63 = vmax.f32 %v162_v62, 0.0 }
 0x101   :  { %662 = vmatprep.mubr.f32.mxu1 %v176_v63 }
 0x102   :  { %663 = vmatmul.mubr.f32.gmra.mxu1 %v177_v0 }
 0x1b6   :  { %v655_v2 = vpop.f32.mrf.mxu1 }
 0x1b7   :  { %v273_v3 = vadd.f32 %v655_v2, %v528_v1 }
 0x1b8   :  { %v267_v5 = vpop.f32.mrf.mxu1 }
 0x1b9   :  { %v312_v6 = vrot.slane %v273_v3, 4  ;;  %v268_v7 = vadd.f32 %v528_v1, %v267_v5 }
 0x1ba   :  { %v658_v8 = vpop.f32.mrf.mxu1 }
 0x1bb   :  { %v313_v9 = vmax.f32 %v273_v3, %v312_v6  ;;  %v306_v10 = vrot.slane %v268_v7, 4  ;;  %v283_v11 = vadd.f32 %v658_v8, %v528_v1 }
 0x1bc   :  { %v277_v12 = vpop.f32.mrf.mxu1 }
 0x1bd   :  { %v314_v13 = vrot.slane %v313_v9, 2  ;;  %v307_v14 = vmax.f32 %v268_v7, %v306_v10  ;;  %v324_v15 = vrot.slane %v283_v11, 4  ;;  %v278_v16 = vadd.f32 %v528_v1, %v277_v12 }
 0x1be   :  { %v661_v17 = vpop.f32.mrf.mxu1 }
 0x1bf   :  { %v315_v18 = vmax.f32 %v313_v9, %v314_v13  ;;  %v308_v19 = vrot.slane %v307_v14, 2  ;;  %v325_v20 = vmax.f32 %v283_v11, %v324_v15  ;;  %v318_v21 = vrot.slane %v278_v16, 4 }
 0x1c0   :  { %v293_v22 = vadd.f32 %v661_v17, %v528_v1  ;;  %v287_v23 = vpop.f32.mrf.mxu1 }
 0x1c1   :  { %v316_v24 = vrot.slane %v315_v18, 1  ;;  %v309_v25 = vmax.f32 %v307_v14, %v308_v19  ;;  %v326_v26 = vrot.slane %v325_v20, 2  ;;  %v319_v27 = vmax.f32 %v278_v16, %v318_v21 }
 0x1c2   :  { %v336_v28 = vrot.slane %v293_v22, 4  ;;  %v288_v36 = vadd.f32 %v528_v1, %v287_v23  ;;  %v664_v37 = vpop.f32.mrf.mxu1 }
 0x1c3   :  { %v317_v38 = vmax.f32 %v315_v18, %v316_v24  ;;  %v310_v39 = vrot.slane %v309_v25, 1  ;;  %v327_v40 = vmax.f32 %v325_v20, %v326_v26  ;;  %v320_v41 = vrot.slane %v319_v27, 2 }
 0x1c4   :  { %v337_v42 = vmax.f32 %v293_v22, %v336_v28  ;;  %v330_v43 = vrot.slane %v288_v36, 4  ;;  %v303_v44 = vadd.f32 %v664_v37, %v528_v1  ;;  %v297_v45 = vpop.f32.mrf.mxu1 }
 0x1c5   :  { %v355_v46 = vsub.f32 %v273_v3, %v317_v38  ;;  %v311_v47 = vmax.f32 %v309_v25, %v310_v39  ;;  %v328_v48 = vrot.slane %v327_v40, 1  ;;  %v321_v49 = vmax.f32 %v319_v27, %v320_v41 }
 0x1c6   :  { %v338_v50 = vrot.slane %v337_v42, 2  ;;  %v331_v51 = vmax.f32 %v288_v36, %v330_v43  ;;  %v348_v52 = vrot.slane %v303_v44, 4  ;;  %v298_v53 = vadd.f32 %v528_v1, %v297_v45 }
 0x1c7   :  { %v364_v54 = vmul.f32 1.442695, %v355_v46  ;;  %v354_v55 = vsub.f32 %v268_v7, %v311_v47  ;;  %v329_v56 = vmax.f32 %v327_v40, %v328_v48  ;;  %v322_v57 = vrot.slane %v321_v49, 1 }
 0x1c8   :  { %v339_v58 = vmax.f32 %v337_v42, %v338_v50  ;;  %v332_v59 = vrot.slane %v331_v51, 2  ;;  %v349_v60 = vmax.f32 %v303_v44, %v348_v52  ;;  %v342_v61 = vrot.slane %v298_v53, 4 }
 0x1c9   :  { %668 = vpow2.f32 %v364_v54  ;;  %v362_v62 = vmul.f32 1.442695, %v354_v55  ;;  %v357_v63 = vsub.f32 %v283_v11, %v329_v56  ;;  %v323_v0 = vmax.f32 %v321_v49, %v322_v57 }
 0x1ca   :  { %v340_v2 = vrot.slane %v339_v58, 1  ;;  %v333_v3 = vmax.f32 %v331_v51, %v332_v59  ;;  %v350_v5 = vrot.slane %v349_v60, 2  ;;  %v343_v6 = vmax.f32 %v298_v53, %v342_v61 }
 0x1cb   :  { %670 = vpow2.f32 %v362_v62  ;;  %v368_v8 = vmul.f32 1.442695, %v357_v63  ;;  %v356_v9 = vsub.f32 %v278_v16, %v323_v0 }
 0x1cc   :  { %v341_v1 = vmax.f32 %v339_v58, %v340_v2  ;;  %v334_v10 = vrot.slane %v333_v3, 1  ;;  %v351_v7 = vmax.f32 %v349_v60, %v350_v5  ;;  %v344_v12 = vrot.slane %v343_v6, 2 }
 0x1cd   :  { %672 = vpow2.f32 %v368_v8  ;;  %v366_v13 = vmul.f32 1.442695, %v356_v9 }
 0x1ce   :  { %v359_v14 = vsub.f32 %v293_v22, %v341_v1  ;;  %v335_v15 = vmax.f32 %v333_v3, %v334_v10  ;;  %v352_v17 = vrot.slane %v351_v7, 1  ;;  %v345_v18 = vmax.f32 %v343_v6, %v344_v12 }
 0x1cf   :  { %674 = vpow2.f32 %v366_v13 }
 0x1d0   :  { %v358_v11 = vsub.f32 %v288_v36, %v335_v15  ;;  %v353_v19 = vmax.f32 %v351_v7, %v352_v17  ;;  %v346_v20 = vrot.slane %v345_v18, 1  ;;  %v372_v21 = vmul.f32 1.442695, %v359_v14 }
 0x1d2   :  { %v361_v23 = vsub.f32 %v303_v44, %v353_v19  ;;  %v347_v24 = vmax.f32 %v345_v18, %v346_v20  ;;  %v370_v25 = vmul.f32 1.442695, %v358_v11  ;;  %676 = vpow2.f32 %v372_v21 }
 0x1d4   :  { %v360_v26 = vsub.f32 %v298_v53, %v347_v24  ;;  %v376_v27 = vmul.f32 1.442695, %v361_v23  ;;  %678 = vpow2.f32 %v370_v25 }
 0x1d6   :  { %v669_v16 = vpop.eup %668  ;;  %v374_v38 = vmul.f32 1.442695, %v360_v26  ;;  %680 = vpow2.f32 %v376_v27 }
 0x1d7   :  { %v384_v28 = vrot.slane %v669_v16, 4  ;;  %v427_v50 = vmul.f32 %v669_v16, %v815_v29 }
 0x1d8   :  { %v671_v37 = vpop.eup %670  ;;  %682 = vpow2.f32 %v374_v38 }
 0x1d9   :  { %v385_v22 = vadd.f32 %v669_v16, %v384_v28  ;;  %v378_v39 = vrot.slane %v671_v37, 4  ;;  %v426_v46 = vmul.f32 %v671_v37, %v773_v4  ;;  %v440_v60 = vrot.slane %v427_v50, 4 }
 0x1da   :  { %v673_v40 = vpop.eup %672 }
 0x1db   :  { %v386_v41 = vrot.slane %v385_v22, 2  ;;  %v379_v36 = vadd.f32 %v671_v37, %v378_v39  ;;  %v396_v43 = vrot.slane %v673_v40, 4  ;;  %v434_v56 = vrot.slane %v426_v46, 4 }
 0x1dc   :  { %v675_v42 = vpop.eup %674  ;;  %v429_v61 = vmul.f32 %v673_v40, %v827_v31  ;;  %v441_v10 = vadd.f32 %v440_v60, %v427_v50 }
 0x1dd   :  { %v387_v44 = vadd.f32 %v386_v41, %v385_v22  ;;  %v380_v45 = vrot.slane %v379_v36, 2  ;;  %v397_v47 = vadd.f32 %v673_v40, %v396_v43  ;;  %v390_v48 = vrot.slane %v675_v42, 4 }
 0x1de   :  { %v428_v58 = vmul.f32 %v675_v42, %v820_v30  ;;  %v435_v3 = vadd.f32 %v434_v56, %v426_v46  ;;  %v452_v7 = vrot.slane %v429_v61, 4  ;;  %v442_v28 = vrot.slane %v441_v10, 2 }
 0x1df   :  { %v381_v49 = vadd.f32 %v380_v45, %v379_v36  ;;  %v391_v51 = vadd.f32 %v675_v42, %v390_v48  ;;  %v388_v52 = vrot.slane %v387_v44, 1  ;;  %v398_v53 = vrot.slane %v397_v47, 2  ;;  %v677_v54 = vpop.eup %676 }
 0x1e0   :  { %v408_v0 = vrot.slane %v677_v54, 4  ;;  %v446_v5 = vrot.slane %v428_v58, 4  ;;  %v436_v15 = vrot.slane %v435_v3, 2  ;;  %v431_v19 = vmul.f32 %v677_v54, %v839_v33 }
 0x1e1   :  { %v382_v55 = vrot.slane %v381_v49, 1  ;;  %v392_v57 = vrot.slane %v391_v51, 2  ;;  %v679_v59 = vpop.eup %678  ;;  %v389_v4 = vadd.f32 %v388_v52, %v387_v44  ;;  %v399_v63 = vadd.f32 %v398_v53, %v397_v47 }
 0x1e2   :  { %v409_v8 = vadd.f32 %v677_v54, %v408_v0  ;;  %v402_v9 = vrot.slane %v679_v59, 4  ;;  %v430_v1 = vmul.f32 %v679_v59, %v832_v32  ;;  %v447_v17 = vadd.f32 %v446_v5, %v428_v58 }
 0x1e3   :  { %v393_v62 = vadd.f32 %v392_v57, %v391_v51  ;;  %v383_v2 = vadd.f32 %v382_v55, %v381_v49  ;;  %v681_v6 = vpop.eup %680  ;;  %684 = vrcp.f32 %v389_v4  ;;  %v400_v13 = vrot.slane %v399_v63, 1 }
 0x1e4   :  { %v410_v31 = vrot.slane %v409_v8, 2  ;;  %v403_v14 = vadd.f32 %v679_v59, %v402_v9  ;;  %v420_v18 = vrot.slane %v681_v6, 4  ;;  %v458_v21 = vrot.slane %v430_v1, 4 }
 0x1e5   :  { %v394_v29 = vrot.slane %v393_v62, 1  ;;  %v683_v12 = vpop.eup %682  ;;  %686 = vrcp.f32 %v383_v2  ;;  %v401_v25 = vadd.f32 %v400_v13, %v399_v63  ;;  %v433_v27 = vmul.f32 %v681_v6, %v851_v35 }
 0x1e6   :  { %v411_v11 = vadd.f32 %v410_v31, %v409_v8  ;;  %v404_v20 = vrot.slane %v403_v14, 2  ;;  %v421_v23 = vadd.f32 %v681_v6, %v420_v18  ;;  %v414_v32 = vrot.slane %v683_v12, 4 }
 0x1e7   :  { %v395_v30 = vadd.f32 %v394_v29, %v393_v62  ;;  %v432_v24 = vmul.f32 %v683_v12, %v844_v34  ;;  %v448_v37 = vrot.slane %v447_v17, 2  ;;  %v453_v39 = vadd.f32 %v452_v7, %v429_v61 }
 0x1e8   :  { %v412_v26 = vrot.slane %v411_v11, 1  ;;  %v405_v16 = vadd.f32 %v404_v20, %v403_v14  ;;  %v422_v38 = vrot.slane %v421_v23, 2  ;;  %v415_v22 = vadd.f32 %v683_v12, %v414_v32 }
 0x1e9   :  { %688 = vrcp.f32 %v395_v30  ;;  %v464_v40 = vrot.slane %v431_v19, 4  ;;  %v459_v33 = vadd.f32 %v458_v21, %v430_v1  ;;  %v437_v36 = vadd.f32 %v436_v15, %v435_v3 }
 0x1ea   :  { %v406_v41 = vrot.slane %v405_v16, 1  ;;  %v423_v42 = vadd.f32 %v422_v38, %v421_v23  ;;  %v416_v43 = vrot.slane %v415_v22, 2  ;;  %v470_v44 = vrot.slane %v432_v24, 4 }
 0x1eb   :  { %690 = vrcp.f32 %v401_v25  ;;  %v413_v45 = vadd.f32 %v412_v26, %v411_v11  ;;  %v476_v46 = vrot.slane %v433_v27, 4  ;;  %v443_v47 = vadd.f32 %v442_v28, %v441_v10 }
 0x1ec   :  { %v407_v34 = vadd.f32 %v406_v41, %v405_v16  ;;  %v449_v48 = vadd.f32 %v448_v37, %v447_v17  ;;  %v424_v49 = vrot.slane %v423_v42, 1  ;;  %v417_v35 = vadd.f32 %v416_v43, %v415_v22 }
 0x1ed   :  { %v454_v50 = vrot.slane %v453_v39, 2  ;;  %v465_v51 = vadd.f32 %v464_v40, %v431_v19  ;;  %v460_v52 = vrot.slane %v459_v33, 2  ;;  %v471_v55 = vadd.f32 %v470_v44, %v432_v24 }
 0x1ee   :  { %692 = vrcp.f32 %v407_v34  ;;  %v425_v53 = vadd.f32 %v424_v49, %v423_v42  ;;  %v418_v54 = vrot.slane %v417_v35, 1  ;;  %v438_v56 = vrot.slane %v437_v36, 1 }
 0x1ef   :  { %694 = vrcp.f32 %v413_v45  ;;  %v477_v57 = vadd.f32 %v476_v46, %v433_v27  ;;  %v444_v59 = vrot.slane %v443_v47, 1  ;;  %v450_v60 = vrot.slane %v449_v48, 1 }
 0x1f0   :  { %v685_v58 = vpop.eup %684  ;;  %v419_v61 = vadd.f32 %v418_v54, %v417_v35  ;;  %v455_v4 = vadd.f32 %v454_v50, %v453_v39  ;;  %v466_v63 = vrot.slane %v465_v51, 2  ;;  %v461_v0 = vadd.f32 %v460_v52, %v459_v33 }
 0x1f1   :  { %696 = vrcp.f32 %v425_v53  ;;  %v472_v2 = vrot.slane %v471_v55, 2  ;;  %v439_v29 = vadd.f32 %v438_v56, %v437_v36  ;;  %v478_v5 = vrot.slane %v477_v57, 2 }
 0x1f2   :  { %v687_v62 = vpop.eup %686  ;;  %698 = vrcp.f32 %v419_v61  ;;  %v445_v6 = vadd.f32 %v444_v59, %v443_v47  ;;  %v451_v8 = vadd.f32 %v450_v60, %v449_v48  ;;  %v456_v1 = vrot.slane %v455_v4, 1 }
 0x1f3   :  { %v483_v9 = vmul.f32 %v687_v62, %v439_v29  ;;  %v467_v10 = vadd.f32 %v466_v63, %v465_v51  ;;  %v462_v7 = vrot.slane %v461_v0, 1  ;;  %v473_v12 = vadd.f32 %v472_v2, %v471_v55 }
 0x1f4   :  { %v485_v13 = vmul.f32 %v685_v58, %v445_v6  ;;  %v479_v31 = vadd.f32 %v478_v5, %v477_v57  ;;  %v457_v17 = vadd.f32 %v456_v1, %v455_v4 }
 0x1f5   :  { %v468_v18 = vrot.slane %v467_v10, 1  ;;  %v463_v11 = vadd.f32 %v462_v7, %v461_v0  ;;  %v474_v21 = vrot.slane %v473_v12, 1 }
 0x1f6   :  { %v689_v3 = vpop.eup %688  ;;  %v507_v15 = vsel %vm506_vm0, %v485_v13, %v483_v9  ;;  %v480_v24 = vrot.slane %v479_v31, 1 }
 0x1f7   :  { %v487_v30 = vmul.f32 %v689_v3, %v451_v8  ;;  %v469_v26 = vadd.f32 %v468_v18, %v467_v10  ;;  %v475_v37 = vadd.f32 %v474_v21, %v473_v12 }
 0x1f8   :  { %v691_v14 = vpop.eup %690  ;;  %v481_v39 = vadd.f32 %v480_v24, %v479_v31 }
 0x1f9   :  { %v509_v20 = vsel %vm508_vm1, %v487_v30, %v507_v15  ;;  %v489_v23 = vmul.f32 %v691_v14, %v457_v17 }
 0x1fb   :  { %v693_v19 = vpop.eup %692  ;;  %v511_v16 = vsel %vm510_vm2, %v489_v23, %v509_v20 }
 0x1fc   :  { %v491_v32 = vmul.f32 %v693_v19, %v463_v11  ;;  %v695_v25 = vpop.eup %694 }
 0x1fd   :  { %v493_v22 = vmul.f32 %v695_v25, %v469_v26 }
 0x1fe   :  { %v697_v27 = vpop.eup %696  ;;  %v513_v28 = vsel %vm512_vm3, %v491_v32, %v511_v16 }
 0x1ff   :  { %v699_v38 = vpop.eup %698  ;;  %v497_v41 = vmul.f32 %v697_v27, %v481_v39  ;;  %v515_v33 = vsel %vm514_vm4, %v493_v22, %v513_v28 }
 0x200   :  { %v495_v40 = vmul.f32 %v699_v38, %v475_v37 }
 0x202   :  { %v517_v36 = vsel %vm516_vm5, %v495_v40, %v515_v33 }
 0x203   :  { %v519_v42 = vsel %vm518_vm6, %v497_v41, %v517_v36 }
 0x204   :  { %521 = vst [vmem:[%s876_s5] sm:$0xff] %v519_v42 }
 0x205   :  { %526 = vsyncpa [#allocation3], 1 }

// kernel: _s2tsa_apply.1
= control target key start
LH: loop header
LB: loop body
LE: loop exit
PB: predicated region body
PF: predicated region fallthrough
CT: control target
= control target key end

     0   :  { %10 = vsyncpa [#allocation3], 0  ;;  %s722_s18 = smov [#allocation2]   ;;  %s871_s0 = inlined_call_operand.vmem [shape: f32[8,8,128], index: 0, kind: input, shape index: {}]   ;;  %s872_s1 = inlined_call_operand.vmem [shape: f32[128,128], index: 1, kind: input, shape index: {}]   ;;  %s873_s2 = inlined_call_operand.vmem [shape: f32[1,128], index: 2, kind: input, shape index: {}]   ;;  %s874_s3 = inlined_call_operand.hbm [shape: f32[128,128], index: 3, kind: input, shape index: {}]   ;;  %s875_s4 = inlined_call_operand.vmem [shape: f32[1,128], index: 4, kind: input, shape index: {}]   ;;  %s876_s5 = inlined_call_operand.vmem [shape: f32[8,128], index: 5, kind: output, shape index: {}]  }
   0x1   :  { %s22_s19 = sshll.u32 %s722_s18, 4  ;;  %s23_s19 = int_to_ptr.vmem [resolvable:$true] %s22_s19 }
   0x2   :  { %s708_s20 = scalar_lea.vmem %s23_s19, 2048  ;;  %p713_p1 = scmp.lt.s32.totalorder %s23_s19, %s23_s19 }
   0x3   :  { %p709_p0 = scmp.ne.s32.totalorder %s23_s19, %s708_s20  ;;  %p714_p2 = scmp.lt.s32.totalorder %s708_s20, %s708_s20 }
   0x5   :  { %p715_p3 = por %p714_p2, %p713_p1 }
   0x7   :  { %p716_p4 = pnand %p715_p3, %p709_p0 }
   0x9   :  { %719 = shalt.err (!%p716_p4)
}
   0xa   :  { %s723_s21 = smov 128   ;;  %s724_s22 = smov 8  }
   0xb   :  { %28 = dma.hbm_to_vmem [thread:$0]  %s874_s3, 2048, %s23_s19, [#allocation3], %s723_s21, %s723_s21, %s724_s22  }
   0xc   :  { %720 = dma.done.wait [#allocation3], 2048  }
   0xd   :  { %721 = vsyncadd [#allocation3], 4294965248  ;;  %v57_v0 = vld [vmem:[%s872_s1 + $0x78] sm:$0xff]  ;;  %v56_v1 = vld [vmem:[%s872_s1 + $0x70] sm:$0xff]  ;;  %vm506_vm0 = vcmask 1041409   ;;  %vm508_vm1 = vcmask 1042434  }
   0xe   :  { %577 = vmatprep.subr.mxu0 %v57_v0  ;;  %v55_v2 = vld [vmem:[%s872_s1 + $0x68] sm:$0xff]  ;;  %v54_v3 = vld [vmem:[%s872_s1 + $0x60] sm:$0xff]  ;;  %v53_v5 = vld [vmem:[%s872_s1 + $0x58] sm:$0xff]  ;;  %vm510_vm2 = vcmask 1043459   ;;  %vm512_vm3 = vcmask 1044484   ;;  %vm514_vm4 = vcmask 1045509  }
   0xf   :  { %578 = vmatpush3.msra.mxu0 %v57_v0  ;;  %v773_v4 = vld [vmem:[%s871_s0] sm:$0xff]  ;;  %v52_v6 = vld [vmem:[%s872_s1 + $0x50] sm:$0xff]  ;;  %v193_v7 = vld [vmem:[#allocation2 + $0x78] sm:$0xff]  ;;  %vm516_vm5 = vcmask 1046534   ;;  %vm518_vm6 = vcmask 1047559  }
  0x10   :  { %579 = vmatprep.subr.mxu0 %v56_v1  ;;  %609 = vmatprep.mubr.f32.mxu0 %v773_v4  ;;  %v192_v8 = vld [vmem:[#allocation2 + $0x70] sm:$0xff]  ;;  %v51_v9 = vld [vmem:[%s872_s1 + $0x48] sm:$0xff]  ;;  %v50_v11 = vld [vmem:[%s872_s1 + $0x40] sm:$0xff] }
  0x11   :  { %580 = vmatpush3.msra.mxu0 %v56_v1  ;;  %621 = vmatprep.subr.mxu1 %v193_v7  ;;  %v191_v10 = vld [vmem:[#allocation2 + $0x68] sm:$0xff]  ;;  %v190_v12 = vld [vmem:[#allocation2 + $0x60] sm:$0xff]  ;;  %v49_v13 = vld [vmem:[%s872_s1 + $0x38] sm:$0xff] }
  0x12   :  { %581 = vmatprep.subr.mxu0 %v55_v2  ;;  %622 = vmatpush3.msra.mxu1 %v193_v7  ;;  %v189_v14 = vld [vmem:[#allocation2 + $0x58] sm:$0xff]  ;;  %v48_v15 = vld [vmem:[%s872_s1 + $0x30] sm:$0xff]  ;;  %v47_v17 = vld [vmem:[%s872_s1 + $0x28] sm:$0xff] }
  0x13   :  { %582 = vmatpush3.msra.mxu0 %v55_v2  ;;  %623 = vmatprep.subr.mxu1 %v192_v8  ;;  %v188_v16 = vld [vmem:[#allocation2 + $0x50] sm:$0xff]  ;;  %v187_v18 = vld [vmem:[#allocation2 + $0x48] sm:$0xff]  ;;  %v46_v19 = vld [vmem:[%s872_s1 + $0x20] sm:$0xff] }
  0x14   :  { %583 = vmatprep.subr.mxu0 %v54_v3  ;;  %624 = vmatpush3.msra.mxu1 %v192_v8  ;;  %v186_v20 = vld [vmem:[#allocation2 + $0x40] sm:$0xff]  ;;  %v45_v21 = vld [vmem:[%s872_s1 + $0x18] sm:$0xff]  ;;  %v44_v23 = vld [vmem:[%s872_s1 + $0x10] sm:$0xff] }
  0x15   :  { %584 = vmatpush3.msra.mxu0 %v54_v3  ;;  %625 = vmatprep.subr.mxu1 %v191_v10  ;;  %v185_v22 = vld [vmem:[#allocation2 + $0x38] sm:$0xff]  ;;  %v184_v24 = vld [vmem:[#allocation2 + $0x30] sm:$0xff]  ;;  %v43_v25 = vld [vmem:[%s872_s1 + $0x8] sm:$0xff] }
  0x16   :  { %585 = vmatprep.subr.mxu0 %v53_v5  ;;  %626 = vmatpush3.msra.mxu1 %v191_v10  ;;  %v183_v26 = vld [vmem:[#allocation2 + $0x28] sm:$0xff]  ;;  %v42_v27 = vld [vmem:[%s872_s1] sm:$0xff]  ;;  %v820_v30 = vld [vmem:[%s871_s0 + $0x10] sm:$0xff] }
  0x17   :  { %586 = vmatpush3.msra.mxu0 %v53_v5  ;;  %627 = vmatprep.subr.mxu1 %v190_v12  ;;  %v182_v28 = vld [vmem:[#allocation2 + $0x20] sm:$0xff]  ;;  %v815_v29 = vld [vmem:[%s871_s0 + $0x8] sm:$0xff]  ;;  %v827_v31 = vld [vmem:[%s871_s0 + $0x18] sm:$0xff] }
  0x18   :  { %587 = vmatprep.subr.mxu0 %v52_v6  ;;  %628 = vmatpush3.msra.mxu1 %v190_v12  ;;  %v832_v32 = vld [vmem:[%s871_s0 + $0x20] sm:$0xff]  ;;  %v839_v33 = vld [vmem:[%s871_s0 + $0x28] sm:$0xff]  ;;  %v844_v34 = vld [vmem:[%s871_s0 + $0x30] sm:$0xff] }
  0x19   :  { %588 = vmatpush3.msra.mxu0 %v52_v6  ;;  %629 = vmatprep.subr.mxu1 %v189_v14  ;;  %v851_v35 = vld [vmem:[%s871_s0 + $0x38] sm:$0xff]  ;;  %v180_v37 = vld [vmem:[#allocation2 + $0x10] sm:$0xff]  ;;  %v179_v38 = vld [vmem:[#allocation2 + $0x8] sm:$0xff] }
  0x1a   :  { %589 = vmatprep.subr.mxu0 %v51_v9  ;;  %630 = vmatpush3.msra.mxu1 %v189_v14  ;;  %v181_v36 = vld [vmem:[#allocation2 + $0x18] sm:$0xff]  ;;  %v178_v39 = vld [vmem:[#allocation2] sm:$0xff] }
  0x1b   :  { %590 = vmatpush3.msra.mxu0 %v51_v9  ;;  %631 = vmatprep.subr.mxu1 %v188_v16  ;;  %v527_v40 = vld [vmem:[%s873_s2] ss:$0 sm:$0xff] }
  0x1c   :  { %591 = vmatprep.subr.mxu0 %v50_v11  ;;  %632 = vmatpush3.msra.mxu1 %v188_v16  ;;  %v528_v1 = vld [vmem:[%s875_s4] ss:$0 sm:$0xff] }
  0x1d   :  { %592 = vmatpush3.msra.mxu0 %v50_v11  ;;  %633 = vmatprep.subr.mxu1 %v187_v18 }
  0x1e   :  { %593 = vmatprep.subr.mxu0 %v49_v13  ;;  %634 = vmatpush3.msra.mxu1 %v187_v18 }
  0x1f   :  { %594 = vmatpush3.msra.mxu0 %v49_v13  ;;  %635 = vmatprep.subr.mxu1 %v186_v20 }
  0x20   :  { %595 = vmatprep.subr.mxu0 %v48_v15  ;;  %636 = vmatpush3.msra.mxu1 %v186_v20 }
  0x21   :  { %596 = vmatpush3.msra.mxu0 %v48_v15  ;;  %637 = vmatprep.subr.mxu1 %v185_v22 }
  0x22   :  { %597 = vmatprep.subr.mxu0 %v47_v17  ;;  %638 = vmatpush3.msra.mxu1 %v185_v22 }
  0x23   :  { %598 = vmatpush3.msra.mxu0 %v47_v17  ;;  %639 = vmatprep.subr.mxu1 %v184_v24 }
  0x24   :  { %599 = vmatprep.subr.mxu0 %v46_v19  ;;  %640 = vmatpush3.msra.mxu1 %v184_v24 }
  0x25   :  { %600 = vmatpush3.msra.mxu0 %v46_v19  ;;  %641 = vmatprep.subr.mxu1 %v183_v26 }
  0x26   :  { %601 = vmatprep.subr.mxu0 %v45_v21  ;;  %642 = vmatpush3.msra.mxu1 %v183_v26 }
  0x27   :  { %602 = vmatpush3.msra.mxu0 %v45_v21  ;;  %643 = vmatprep.subr.mxu1 %v182_v28 }
  0x28   :  { %603 = vmatprep.subr.mxu0 %v44_v23  ;;  %644 = vmatpush3.msra.mxu1 %v182_v28 }
  0x29   :  { %604 = vmatpush3.msra.mxu0 %v44_v23  ;;  %645 = vmatprep.subr.mxu1 %v181_v36 }
  0x2a   :  { %605 = vmatprep.subr.mxu0 %v43_v25  ;;  %646 = vmatpush3.msra.mxu1 %v181_v36 }
  0x2b   :  { %606 = vmatpush3.msra.mxu0 %v43_v25  ;;  %647 = vmatprep.subr.mxu1 %v180_v37 }
  0x2c   :  { %607 = vmatprep.subr.mxu0 %v42_v27  ;;  %648 = vmatpush3.msra.mxu1 %v180_v37 }
  0x2d   :  { %608 = vmatpush3.msra.mxu0 %v42_v27  ;;  %649 = vmatprep.subr.mxu1 %v179_v38 }
  0x2e   :  { %610 = vmatmul.mubr.f32.vlgmr.msra.gmra.mxu0 %v815_v29  ;;  %650 = vmatpush3.msra.mxu1 %v179_v38 }
  0x2f   :  { %612 = vmatprep.mubr.f32.mxu0 %v820_v30  ;;  %651 = vmatprep.subr.mxu1 %v178_v39 }
  0x30   :  { %652 = vmatpush3.msra.mxu1 %v178_v39 }
  0x32   :  { %613 = vmatmul.mubr.f32.gmra.mxu0 %v827_v31 }
  0x33   :  { %615 = vmatprep.mubr.f32.mxu0 %v832_v32 }
  0x36   :  { %616 = vmatmul.mubr.f32.gmra.mxu0 %v839_v33 }
  0x37   :  { %618 = vmatprep.mubr.f32.mxu0 %v844_v34 }
  0x3a   :  { %619 = vmatmul.mubr.f32.gmra.mxu0 %v851_v35 }
  0xee   :  { %v611_v41 = vpop.f32.mrf.mxu0 }
  0xef   :  { %v137_v42 = vadd.f32 %v611_v41, %v527_v40 }
  0xf0   :  { %v131_v43 = vpop.f32.mrf.mxu0 }
  0xf1   :  { %v132_v44 = vadd.f32 %v527_v40, %v131_v43  ;;  %v171_v47 = vmax.f32 %v137_v42, 0.0 }
  0xf2   :  { %v614_v45 = vpop.f32.mrf.mxu0 }
  0xf3   :  { %v170_v46 = vmax.f32 %v132_v44, 0.0  ;;  %v147_v48 = vadd.f32 %v614_v45, %v527_v40 }
  0xf4   :  { %v141_v49 = vpop.f32.mrf.mxu0 }
  0xf5   :  { %v142_v50 = vadd.f32 %v527_v40, %v141_v49  ;;  %653 = vmatprep.mubr.f32.mxu1 %v170_v46  ;;  %v173_v53 = vmax.f32 %v147_v48, 0.0 }
  0xf6   :  { %v617_v51 = vpop.f32.mrf.mxu0  ;;  %654 = vmatmul.mubr.f32.vlgmr.msra.gmra.mxu1 %v171_v47 }
  0xf7   :  { %v172_v52 = vmax.f32 %v142_v50, 0.0  ;;  %v157_v54 = vadd.f32 %v617_v51, %v527_v40 }
  0xf8   :  { %v151_v55 = vpop.f32.mrf.mxu0 }
  0xf9   :  { %v152_v56 = vadd.f32 %v527_v40, %v151_v55  ;;  %656 = vmatprep.mubr.f32.mxu1 %v172_v52  ;;  %v175_v59 = vmax.f32 %v157_v54, 0.0 }
  0xfa   :  { %v620_v57 = vpop.f32.mrf.mxu0  ;;  %657 = vmatmul.mubr.f32.gmra.mxu1 %v173_v53 }
  0xfb   :  { %v174_v58 = vmax.f32 %v152_v56, 0.0  ;;  %v167_v60 = vadd.f32 %v620_v57, %v527_v40 }
  0xfc   :  { %v161_v61 = vpop.f32.mrf.mxu0 }
  0xfd   :  { %v162_v62 = vadd.f32 %v527_v40, %v161_v61  ;;  %659 = vmatprep.mubr.f32.mxu1 %v174_v58  ;;  %v177_v0 = vmax.f32 %v167_v60, 0.0 }
  0xfe   :  { %660 = vmatmul.mubr.f32.gmra.mxu1 %v175_v59 }
  0xff   :  { %v176_v63 = vmax.f32 %v162_v62, 0.0 }
 0x101   :  { %662 = vmatprep.mubr.f32.mxu1 %v176_v63 }
 0x102   :  { %663 = vmatmul.mubr.f32.gmra.mxu1 %v177_v0 }
 0x1b6   :  { %v655_v2 = vpop.f32.mrf.mxu1 }
 0x1b7   :  { %v273_v3 = vadd.f32 %v655_v2, %v528_v1 }
 0x1b8   :  { %v267_v5 = vpop.f32.mrf.mxu1 }
 0x1b9   :  { %v312_v6 = vrot.slane %v273_v3, 4  ;;  %v268_v7 = vadd.f32 %v528_v1, %v267_v5 }
 0x1ba   :  { %v658_v8 = vpop.f32.mrf.mxu1 }
 0x1bb   :  { %v313_v9 = vmax.f32 %v273_v3, %v312_v6  ;;  %v306_v10 = vrot.slane %v268_v7, 4  ;;  %v283_v11 = vadd.f32 %v658_v8, %v528_v1 }
 0x1bc   :  { %v277_v12 = vpop.f32.mrf.mxu1 }
 0x1bd   :  { %v314_v13 = vrot.slane %v313_v9, 2  ;;  %v307_v14 = vmax.f32 %v268_v7, %v306_v10  ;;  %v324_v15 = vrot.slane %v283_v11, 4  ;;  %v278_v16 = vadd.f32 %v528_v1, %v277_v12 }
 0x1be   :  { %v661_v17 = vpop.f32.mrf.mxu1 }
 0x1bf   :  { %v315_v18 = vmax.f32 %v313_v9, %v314_v13  ;;  %v308_v19 = vrot.slane %v307_v14, 2  ;;  %v325_v20 = vmax.f32 %v283_v11, %v324_v15  ;;  %v318_v21 = vrot.slane %v278_v16, 4 }
 0x1c0   :  { %v293_v22 = vadd.f32 %v661_v17, %v528_v1  ;;  %v287_v23 = vpop.f32.mrf.mxu1 }
 0x1c1   :  { %v316_v24 = vrot.slane %v315_v18, 1  ;;  %v309_v25 = vmax.f32 %v307_v14, %v308_v19  ;;  %v326_v26 = vrot.slane %v325_v20, 2  ;;  %v319_v27 = vmax.f32 %v278_v16, %v318_v21 }
 0x1c2   :  { %v336_v28 = vrot.slane %v293_v22, 4  ;;  %v288_v36 = vadd.f32 %v528_v1, %v287_v23  ;;  %v664_v37 = vpop.f32.mrf.mxu1 }
 0x1c3   :  { %v317_v38 = vmax.f32 %v315_v18, %v316_v24  ;;  %v310_v39 = vrot.slane %v309_v25, 1  ;;  %v327_v40 = vmax.f32 %v325_v20, %v326_v26  ;;  %v320_v41 = vrot.slane %v319_v27, 2 }
 0x1c4   :  { %v337_v42 = vmax.f32 %v293_v22, %v336_v28  ;;  %v330_v43 = vrot.slane %v288_v36, 4  ;;  %v303_v44 = vadd.f32 %v664_v37, %v528_v1  ;;  %v297_v45 = vpop.f32.mrf.mxu1 }
 0x1c5   :  { %v355_v46 = vsub.f32 %v273_v3, %v317_v38  ;;  %v311_v47 = vmax.f32 %v309_v25, %v310_v39  ;;  %v328_v48 = vrot.slane %v327_v40, 1  ;;  %v321_v49 = vmax.f32 %v319_v27, %v320_v41 }
 0x1c6   :  { %v338_v50 = vrot.slane %v337_v42, 2  ;;  %v331_v51 = vmax.f32 %v288_v36, %v330_v43  ;;  %v348_v52 = vrot.slane %v303_v44, 4  ;;  %v298_v53 = vadd.f32 %v528_v1, %v297_v45 }
 0x1c7   :  { %v364_v54 = vmul.f32 1.442695, %v355_v46  ;;  %v354_v55 = vsub.f32 %v268_v7, %v311_v47  ;;  %v329_v56 = vmax.f32 %v327_v40, %v328_v48  ;;  %v322_v57 = vrot.slane %v321_v49, 1 }
 0x1c8   :  { %v339_v58 = vmax.f32 %v337_v42, %v338_v50  ;;  %v332_v59 = vrot.slane %v331_v51, 2  ;;  %v349_v60 = vmax.f32 %v303_v44, %v348_v52  ;;  %v342_v61 = vrot.slane %v298_v53, 4 }
 0x1c9   :  { %668 = vpow2.f32 %v364_v54  ;;  %v362_v62 = vmul.f32 1.442695, %v354_v55  ;;  %v357_v63 = vsub.f32 %v283_v11, %v329_v56  ;;  %v323_v0 = vmax.f32 %v321_v49, %v322_v57 }
 0x1ca   :  { %v340_v2 = vrot.slane %v339_v58, 1  ;;  %v333_v3 = vmax.f32 %v331_v51, %v332_v59  ;;  %v350_v5 = vrot.slane %v349_v60, 2  ;;  %v343_v6 = vmax.f32 %v298_v53, %v342_v61 }
 0x1cb   :  { %670 = vpow2.f32 %v362_v62  ;;  %v368_v8 = vmul.f32 1.442695, %v357_v63  ;;  %v356_v9 = vsub.f32 %v278_v16, %v323_v0 }
 0x1cc   :  { %v341_v1 = vmax.f32 %v339_v58, %v340_v2  ;;  %v334_v10 = vrot.slane %v333_v3, 1  ;;  %v351_v7 = vmax.f32 %v349_v60, %v350_v5  ;;  %v344_v12 = vrot.slane %v343_v6, 2 }
 0x1cd   :  { %672 = vpow2.f32 %v368_v8  ;;  %v366_v13 = vmul.f32 1.442695, %v356_v9 }
 0x1ce   :  { %v359_v14 = vsub.f32 %v293_v22, %v341_v1  ;;  %v335_v15 = vmax.f32 %v333_v3, %v334_v10  ;;  %v352_v17 = vrot.slane %v351_v7, 1  ;;  %v345_v18 = vmax.f32 %v343_v6, %v344_v12 }
 0x1cf   :  { %674 = vpow2.f32 %v366_v13 }
 0x1d0   :  { %v358_v11 = vsub.f32 %v288_v36, %v335_v15  ;;  %v353_v19 = vmax.f32 %v351_v7, %v352_v17  ;;  %v346_v20 = vrot.slane %v345_v18, 1  ;;  %v372_v21 = vmul.f32 1.442695, %v359_v14 }
 0x1d2   :  { %v361_v23 = vsub.f32 %v303_v44, %v353_v19  ;;  %v347_v24 = vmax.f32 %v345_v18, %v346_v20  ;;  %v370_v25 = vmul.f32 1.442695, %v358_v11  ;;  %676 = vpow2.f32 %v372_v21 }
 0x1d4   :  { %v360_v26 = vsub.f32 %v298_v53, %v347_v24  ;;  %v376_v27 = vmul.f32 1.442695, %v361_v23  ;;  %678 = vpow2.f32 %v370_v25 }
 0x1d6   :  { %v669_v16 = vpop.eup %668  ;;  %v374_v38 = vmul.f32 1.442695, %v360_v26  ;;  %680 = vpow2.f32 %v376_v27 }
 0x1d7   :  { %v384_v28 = vrot.slane %v669_v16, 4  ;;  %v427_v50 = vmul.f32 %v669_v16, %v815_v29 }
 0x1d8   :  { %v671_v37 = vpop.eup %670  ;;  %682 = vpow2.f32 %v374_v38 }
 0x1d9   :  { %v385_v22 = vadd.f32 %v669_v16, %v384_v28  ;;  %v378_v39 = vrot.slane %v671_v37, 4  ;;  %v426_v46 = vmul.f32 %v671_v37, %v773_v4  ;;  %v440_v60 = vrot.slane %v427_v50, 4 }
 0x1da   :  { %v673_v40 = vpop.eup %672 }
 0x1db   :  { %v386_v41 = vrot.slane %v385_v22, 2  ;;  %v379_v36 = vadd.f32 %v671_v37, %v378_v39  ;;  %v396_v43 = vrot.slane %v673_v40, 4  ;;  %v434_v56 = vrot.slane %v426_v46, 4 }
 0x1dc   :  { %v675_v42 = vpop.eup %674  ;;  %v429_v61 = vmul.f32 %v673_v40, %v827_v31  ;;  %v441_v10 = vadd.f32 %v440_v60, %v427_v50 }
 0x1dd   :  { %v387_v44 = vadd.f32 %v386_v41, %v385_v22  ;;  %v380_v45 = vrot.slane %v379_v36, 2  ;;  %v397_v47 = vadd.f32 %v673_v40, %v396_v43  ;;  %v390_v48 = vrot.slane %v675_v42, 4 }
 0x1de   :  { %v428_v58 = vmul.f32 %v675_v42, %v820_v30  ;;  %v435_v3 = vadd.f32 %v434_v56, %v426_v46  ;;  %v452_v7 = vrot.slane %v429_v61, 4  ;;  %v442_v28 = vrot.slane %v441_v10, 2 }
 0x1df   :  { %v381_v49 = vadd.f32 %v380_v45, %v379_v36  ;;  %v391_v51 = vadd.f32 %v675_v42, %v390_v48  ;;  %v388_v52 = vrot.slane %v387_v44, 1  ;;  %v398_v53 = vrot.slane %v397_v47, 2  ;;  %v677_v54 = vpop.eup %676 }
 0x1e0   :  { %v408_v0 = vrot.slane %v677_v54, 4  ;;  %v446_v5 = vrot.slane %v428_v58, 4  ;;  %v436_v15 = vrot.slane %v435_v3, 2  ;;  %v431_v19 = vmul.f32 %v677_v54, %v839_v33 }
 0x1e1   :  { %v382_v55 = vrot.slane %v381_v49, 1  ;;  %v392_v57 = vrot.slane %v391_v51, 2  ;;  %v679_v59 = vpop.eup %678  ;;  %v389_v4 = vadd.f32 %v388_v52, %v387_v44  ;;  %v399_v63 = vadd.f32 %v398_v53, %v397_v47 }
 0x1e2   :  { %v409_v8 = vadd.f32 %v677_v54, %v408_v0  ;;  %v402_v9 = vrot.slane %v679_v59, 4  ;;  %v430_v1 = vmul.f32 %v679_v59, %v832_v32  ;;  %v447_v17 = vadd.f32 %v446_v5, %v428_v58 }
 0x1e3   :  { %v393_v62 = vadd.f32 %v392_v57, %v391_v51  ;;  %v383_v2 = vadd.f32 %v382_v55, %v381_v49  ;;  %v681_v6 = vpop.eup %680  ;;  %684 = vrcp.f32 %v389_v4  ;;  %v400_v13 = vrot.slane %v399_v63, 1 }
 0x1e4   :  { %v410_v31 = vrot.slane %v409_v8, 2  ;;  %v403_v14 = vadd.f32 %v679_v59, %v402_v9  ;;  %v420_v18 = vrot.slane %v681_v6, 4  ;;  %v458_v21 = vrot.slane %v430_v1, 4 }
 0x1e5   :  { %v394_v29 = vrot.slane %v393_v62, 1  ;;  %v683_v12 = vpop.eup %682  ;;  %686 = vrcp.f32 %v383_v2  ;;  %v401_v25 = vadd.f32 %v400_v13, %v399_v63  ;;  %v433_v27 = vmul.f32 %v681_v6, %v851_v35 }
 0x1e6   :  { %v411_v11 = vadd.f32 %v410_v31, %v409_v8  ;;  %v404_v20 = vrot.slane %v403_v14, 2  ;;  %v421_v23 = vadd.f32 %v681_v6, %v420_v18  ;;  %v414_v32 = vrot.slane %v683_v12, 4 }
 0x1e7   :  { %v395_v30 = vadd.f32 %v394_v29, %v393_v62  ;;  %v432_v24 = vmul.f32 %v683_v12, %v844_v34  ;;  %v448_v37 = vrot.slane %v447_v17, 2  ;;  %v453_v39 = vadd.f32 %v452_v7, %v429_v61 }
 0x1e8   :  { %v412_v26 = vrot.slane %v411_v11, 1  ;;  %v405_v16 = vadd.f32 %v404_v20, %v403_v14  ;;  %v422_v38 = vrot.slane %v421_v23, 2  ;;  %v415_v22 = vadd.f32 %v683_v12, %v414_v32 }
 0x1e9   :  { %688 = vrcp.f32 %v395_v30  ;;  %v464_v40 = vrot.slane %v431_v19, 4  ;;  %v459_v33 = vadd.f32 %v458_v21, %v430_v1  ;;  %v437_v36 = vadd.f32 %v436_v15, %v435_v3 }
 0x1ea   :  { %v406_v41 = vrot.slane %v405_v16, 1  ;;  %v423_v42 = vadd.f32 %v422_v38, %v421_v23  ;;  %v416_v43 = vrot.slane %v415_v22, 2  ;;  %v470_v44 = vrot.slane %v432_v24, 4 }
 0x1eb   :  { %690 = vrcp.f32 %v401_v25  ;;  %v413_v45 = vadd.f32 %v412_v26, %v411_v11  ;;  %v476_v46 = vrot.slane %v433_v27, 4  ;;  %v443_v47 = vadd.f32 %v442_v28, %v441_v10 }
 0x1ec   :  { %v407_v34 = vadd.f32 %v406_v41, %v405_v16  ;;  %v449_v48 = vadd.f32 %v448_v37, %v447_v17  ;;  %v424_v49 = vrot.slane %v423_v42, 1  ;;  %v417_v35 = vadd.f32 %v416_v43, %v415_v22 }
 0x1ed   :  { %v454_v50 = vrot.slane %v453_v39, 2  ;;  %v465_v51 = vadd.f32 %v464_v40, %v431_v19  ;;  %v460_v52 = vrot.slane %v459_v33, 2  ;;  %v471_v55 = vadd.f32 %v470_v44, %v432_v24 }
 0x1ee   :  { %692 = vrcp.f32 %v407_v34  ;;  %v425_v53 = vadd.f32 %v424_v49, %v423_v42  ;;  %v418_v54 = vrot.slane %v417_v35, 1  ;;  %v438_v56 = vrot.slane %v437_v36, 1 }
 0x1ef   :  { %694 = vrcp.f32 %v413_v45  ;;  %v477_v57 = vadd.f32 %v476_v46, %v433_v27  ;;  %v444_v59 = vrot.slane %v443_v47, 1  ;;  %v450_v60 = vrot.slane %v449_v48, 1 }
 0x1f0   :  { %v685_v58 = vpop.eup %684  ;;  %v419_v61 = vadd.f32 %v418_v54, %v417_v35  ;;  %v455_v4 = vadd.f32 %v454_v50, %v453_v39  ;;  %v466_v63 = vrot.slane %v465_v51, 2  ;;  %v461_v0 = vadd.f32 %v460_v52, %v459_v33 }
 0x1f1   :  { %696 = vrcp.f32 %v425_v53  ;;  %v472_v2 = vrot.slane %v471_v55, 2  ;;  %v439_v29 = vadd.f32 %v438_v56, %v437_v36  ;;  %v478_v5 = vrot.slane %v477_v57, 2 }
 0x1f2   :  { %v687_v62 = vpop.eup %686  ;;  %698 = vrcp.f32 %v419_v61  ;;  %v445_v6 = vadd.f32 %v444_v59, %v443_v47  ;;  %v451_v8 = vadd.f32 %v450_v60, %v449_v48  ;;  %v456_v1 = vrot.slane %v455_v4, 1 }
 0x1f3   :  { %v483_v9 = vmul.f32 %v687_v62, %v439_v29  ;;  %v467_v10 = vadd.f32 %v466_v63, %v465_v51  ;;  %v462_v7 = vrot.slane %v461_v0, 1  ;;  %v473_v12 = vadd.f32 %v472_v2, %v471_v55 }
 0x1f4   :  { %v485_v13 = vmul.f32 %v685_v58, %v445_v6  ;;  %v479_v31 = vadd.f32 %v478_v5, %v477_v57  ;;  %v457_v17 = vadd.f32 %v456_v1, %v455_v4 }
 0x1f5   :  { %v468_v18 = vrot.slane %v467_v10, 1  ;;  %v463_v11 = vadd.f32 %v462_v7, %v461_v0  ;;  %v474_v21 = vrot.slane %v473_v12, 1 }
 0x1f6   :  { %v689_v3 = vpop.eup %688  ;;  %v507_v15 = vsel %vm506_vm0, %v485_v13, %v483_v9  ;;  %v480_v24 = vrot.slane %v479_v31, 1 }
 0x1f7   :  { %v487_v30 = vmul.f32 %v689_v3, %v451_v8  ;;  %v469_v26 = vadd.f32 %v468_v18, %v467_v10  ;;  %v475_v37 = vadd.f32 %v474_v21, %v473_v12 }
 0x1f8   :  { %v691_v14 = vpop.eup %690  ;;  %v481_v39 = vadd.f32 %v480_v24, %v479_v31 }
 0x1f9   :  { %v509_v20 = vsel %vm508_vm1, %v487_v30, %v507_v15  ;;  %v489_v23 = vmul.f32 %v691_v14, %v457_v17 }
 0x1fb   :  { %v693_v19 = vpop.eup %692  ;;  %v511_v16 = vsel %vm510_vm2, %v489_v23, %v509_v20 }
 0x1fc   :  { %v491_v32 = vmul.f32 %v693_v19, %v463_v11  ;;  %v695_v25 = vpop.eup %694 }
 0x1fd   :  { %v493_v22 = vmul.f32 %v695_v25, %v469_v26 }
 0x1fe   :  { %v697_v27 = vpop.eup %696  ;;  %v513_v28 = vsel %vm512_vm3, %v491_v32, %v511_v16 }
 0x1ff   :  { %v699_v38 = vpop.eup %698  ;;  %v497_v41 = vmul.f32 %v697_v27, %v481_v39  ;;  %v515_v33 = vsel %vm514_vm4, %v493_v22, %v513_v28 }
 0x200   :  { %v495_v40 = vmul.f32 %v699_v38, %v475_v37 }
 0x202   :  { %v517_v36 = vsel %vm516_vm5, %v495_v40, %v515_v33 }
 0x203   :  { %v519_v42 = vsel %vm518_vm6, %v497_v41, %v517_v36 }
 0x204   :  { %521 = vst [vmem:[%s876_s5] sm:$0xff] %v519_v42 }
 0x205   :  { %526 = vsyncpa [#allocation3], 1 }

</bundles_post_ra>
